<compile_context>
chip_gen: v6e
topology: v6e:2x2x1
jax: 0.10.0
libtpu: 0.0.40
codegen_flags: <defaults>
</compile_context>

<pallas_src>
import functools

import jax
import jax.numpy as jnp
from jax.experimental import pallas as pl
from jax.experimental.pallas import tpu as pltpu

_LANE = 128
_SUBLANE = 8
_MAX_TILE_ROWS = 2048            # 2048 x 128 f32 = 1 MiB per block per buffer
_SMALL_NUMEL = 16384             # below this, fused XLA beats kernel launch cost
_VMEM_LIMIT_CAP = 32 * 1024 * 1024  # safe scoped-VMEM request on v5e/v6e/v7x


def _round_up(x, m):
    return ((x + m - 1) // m) * m


def _cdiv(a, b):
    return -(-a // b)


def _is_v7x():
    """v7x has 2 TensorCores/chip; v5e/v6e have 1 (extra splits only help v7x)."""
    try:
        kind = jax.devices()[0].device_kind.lower()
    except Exception:
        return False
    return ("v7" in kind) or ("tpu7" in kind) or ("7x" in kind)


_IS_V7X = _is_v7x()
_SPLITS = 2 if _IS_V7X else 1


def _mosaic_params(semantics, per_step_block_bytes):
    # Double-buffered working set plus slack, clamped to a limit that is safe
    # on v5e/v6e (128 MiB physical) and v7x (64 MiB per TensorCore).
    limit = int(min(_VMEM_LIMIT_CAP,
                    max(16 * 1024 * 1024, 2 * per_step_block_bytes + (4 << 20))))
    return pltpu.CompilerParams(dimension_semantics=semantics,
                                vmem_limit_bytes=limit)


# ---------------------------------------------------------------------------
# Kernels
# ---------------------------------------------------------------------------

def _elem_w_kernel(loss_weight, pred_ref, target_ref, weight_ref, out_ref):
    d = pred_ref[...].astype(jnp.float32) - target_ref[...].astype(jnp.float32)
    out_ref[...] = (d * d * weight_ref[...].astype(jnp.float32)
                    * loss_weight).astype(out_ref.dtype)


def _elem_nw_kernel(loss_weight, pred_ref, target_ref, out_ref):
    d = pred_ref[...].astype(jnp.float32) - target_ref[...].astype(jnp.float32)
    out_ref[...] = (d * d * loss_weight).astype(out_ref.dtype)


def _sum_w_kernel(pred_ref, target_ref, weight_ref, out_ref):
    # Grid is (splits, steps); out block depends only on the split index, so it
    # stays resident in VMEM across the 'arbitrary' k axis (one private (8,128)
    # accumulator per TensorCore on v7x).
    k = pl.program_id(1)

    @pl.when(k == 0)
    def _():
        out_ref[...] = jnp.zeros_like(out_ref)

    d = pred_ref[...].astype(jnp.float32) - target_ref[...].astype(jnp.float32)
    sq = d * d * weight_ref[...].astype(jnp.float32)
    # Layout-preserving (tile,128)->(tile//8,8,128) split; the axis-0 sum is
    # pure VALU vreg adds (no XLU), accumulated into one (8,128) vreg.
    out_ref[...] += jnp.sum(sq.reshape(-1, _SUBLANE, _LANE), axis=0)


def _sum_nw_kernel(pred_ref, target_ref, out_ref):
    k = pl.program_id(1)

    @pl.when(k == 0)
    def _():
        out_ref[...] = jnp.zeros_like(out_ref)

    d = pred_ref[...].astype(jnp.float32) - target_ref[...].astype(jnp.float32)
    sq = d * d
    out_ref[...] += jnp.sum(sq.reshape(-1, _SUBLANE, _LANE), axis=0)


# ---------------------------------------------------------------------------
# pallas_call wrappers
# ---------------------------------------------------------------------------

def _run_elem(pred2d, target2d, weight2d, tile_rows, grid_steps, loss_weight,
              out_dtype):
    rows = pred2d.shape[0]
    spec = pl.BlockSpec((tile_rows, _LANE), lambda i: (i, 0))
    if weight2d is None:
        kernel = functools.partial(_elem_nw_kernel, loss_weight)
        in_specs = [spec, spec]
        args = (pred2d, target2d)
    else:
        kernel = functools.partial(_elem_w_kernel, loss_weight)
        in_specs = [spec, spec, spec]
        args = (pred2d, target2d, weight2d)
    block_bytes = tile_rows * _LANE * (sum(a.dtype.itemsize for a in args)
                                       + jnp.dtype(out_dtype).itemsize)
    return pl.pallas_call(
        kernel,
        out_shape=jax.ShapeDtypeStruct((rows, _LANE), out_dtype),
        grid_spec=pltpu.PrefetchScalarGridSpec(
            num_scalar_prefetch=0,
            grid=(grid_steps,),
            in_specs=in_specs,
            out_specs=spec,
        ),
        compiler_params=_mosaic_params(("parallel",), block_bytes),
    )(*args)


def _run_sum(pred2d, target2d, weight2d, tile_rows, splits, steps):
    # Inputs are (rows_avail, 128) with rows_avail >= splits*steps*tile_rows;
    # the grid only ever touches the first splits*steps*tile_rows rows, so no
    # out-of-bounds data can enter the reduction.
    in_spec = pl.BlockSpec((tile_rows, _LANE), lambda c, k: (c * steps + k, 0))
    out_spec = pl.BlockSpec((_SUBLANE, _LANE), lambda c, k: (c, 0))
    if weight2d is None:
        kernel = _sum_nw_kernel
        in_specs = [in_spec, in_spec]
        args = (pred2d, target2d)
    else:
        kernel = _sum_w_kernel
        in_specs = [in_spec, in_spec, in_spec]
        args = (pred2d, target2d, weight2d)
    block_bytes = tile_rows * _LANE * sum(a.dtype.itemsize for a in args)
    partials = pl.pallas_call(
        kernel,
        out_shape=jax.ShapeDtypeStruct((splits * _SUBLANE, _LANE), jnp.float32),
        grid_spec=pltpu.PrefetchScalarGridSpec(
            num_scalar_prefetch=0,
            grid=(splits, steps),
            in_specs=in_specs,
            out_specs=out_spec,
        ),
        compiler_params=_mosaic_params(("parallel", "arbitrary"), block_bytes),
    )(*args)
    return jnp.sum(partials)   # tiny (splits*8, 128) reduce in the wrapper


# ---------------------------------------------------------------------------
# Glue
# ---------------------------------------------------------------------------

def _as_float(x):
    if not jnp.issubdtype(x.dtype, jnp.floating):
        return x.astype(jnp.float32)
    return x


def _plan_elem(rows):
    """Pick (tile_rows, grid_steps) for the elementwise path."""
    steps = _cdiv(rows, _MAX_TILE_ROWS)
    if _IS_V7X and steps == 1 and rows >= 2 * _SUBLANE:
        steps = 2  # give both TensorCores a block on the 'parallel' axis
    if steps == 1:
        return rows, 1                       # full-dim block: always legal
    tile = min(_MAX_TILE_ROWS, _round_up(_cdiv(rows, steps), _SUBLANE))
    return tile, _cdiv(rows, tile)


def _jnp_fallback(pred, target, weight, reduction, avg_factor, lw, numel,
                  out_dtype):
    p = pred.astype(jnp.float32)
    t = target.astype(jnp.float32)
    loss = (p - t) ** 2
    if weight is not None:
        loss = loss * jnp.broadcast_to(weight, pred.shape).astype(jnp.float32)
    if reduction == 'none':
        return (lw * loss).astype(out_dtype)
    total = lw * jnp.sum(loss)
    if reduction == 'sum':
        return total
    denom = (jnp.asarray(avg_factor, jnp.float32) if avg_factor is not None
             else jnp.float32(numel))
    return total / denom


def mse_loss_pallas(pred, target, weight=None, reduction='mean',
                    avg_factor=None, loss_weight=1.0):
    """Equivalent of mmdet MSELoss.forward."""
    if reduction not in ('none', 'mean', 'sum'):
        raise ValueError(f'invalid reduction: {reduction}')
    if avg_factor is not None and reduction != 'mean':
        # mmdet weight_reduce_loss raises in these cases
        raise ValueError('avg_factor can only be used with reduction="mean"')

    orig_shape = pred.shape
    numel = 1
    for s in orig_shape:
        numel *= s
    lw = float(loss_weight)

    out_dtype = jnp.result_type(pred.dtype, target.dtype)
    if not jnp.issubdtype(out_dtype, jnp.floating):
        out_dtype = jnp.float32

    # Small tensors: kernel launch + pipeline warmup would dominate.
    if numel < _SMALL_NUMEL:
        return _jnp_fallback(pred, target, weight, reduction, avg_factor, lw,
                             numel, out_dtype)

    pred_f = _as_float(pred)
    target_f = _as_float(target)
    weight_f = None
    if weight is not None:
        # weight is assumed elementwise; broadcast to pred's shape if needed.
        weight_f = jnp.broadcast_to(_as_float(weight), orig_shape)

    if reduction == 'none':
        if numel % _LANE == 0:
            # Fast path: reshape to (rows, 128) is a free bitcast; a trailing
            # block that does not divide the tile is handled by Pallas
            # boundary-block masking (elementwise -> always correct).
            rows = numel // _LANE
            tile, grid_steps = _plan_elem(rows)
            pred2d = pred_f.reshape(rows, _LANE)
            target2d = target_f.reshape(rows, _LANE)
            weight2d = None if weight_f is None else weight_f.reshape(rows, _LANE)
            out = _run_elem(pred2d, target2d, weight2d, tile, grid_steps, lw,
                            out_dtype)
            return out.reshape(orig_shape)
        # Slow path (numel not a multiple of 128): pad + crop each cost one
        # extra HBM pass; 128-aligned sizes are the fast path.
        rows0 = _round_up(_cdiv(numel, _LANE), _SUBLANE)
        tile, grid_steps = _plan_elem(rows0)
        rows = grid_steps * tile

        def _pad2d(x):
            flat = x.reshape(-1)
            return jnp.pad(flat, (0, rows * _LANE - numel)).reshape(rows, _LANE)

        pred2d = _pad2d(pred_f)
        target2d = _pad2d(target_f)
        weight2d = None if weight_f is None else _pad2d(weight_f)
        out = _run_elem(pred2d, target2d, weight2d, tile, grid_steps, lw,
                        out_dtype)
        return out.reshape(-1)[:numel].reshape(orig_shape)

    # ---- sum / mean -------------------------------------------------------
    splits = _SPLITS
    rows_floor = numel // _LANE
    steps = _cdiv(rows_floor, splits * _MAX_TILE_ROWS)
    tile = max(_SUBLANE, (rows_floor // (splits * steps)) // _SUBLANE * _SUBLANE)
    rows_main = splits * steps * tile
    main_elems = rows_main * _LANE

    pred_flat = pred_f.reshape(-1)
    target_flat = target_f.reshape(-1)
    weight_flat = None if weight_f is None else weight_f.reshape(-1)

    def _to2d(flat):
        if numel % _LANE == 0:
            return flat.reshape(rows_floor, _LANE)            # free bitcast
        return flat[: rows_floor * _LANE].reshape(rows_floor, _LANE)

    pred2d = _to2d(pred_flat)
    target2d = _to2d(target_flat)
    weight2d = None if weight_flat is None else _to2d(weight_flat)

    total = _run_sum(pred2d, target2d, weight2d, tile, splits, steps)

    tail = numel - main_elems
    if tail:  # tiny ragged remainder (<~0.4% of numel + 128 elems), plain jnp
        dt = (pred_flat[main_elems:].astype(jnp.float32)
              - target_flat[main_elems:].astype(jnp.float32))
        sq_t = dt * dt
        if weight_flat is not None:
            sq_t = sq_t * weight_flat[main_elems:].astype(jnp.float32)
        total = total + jnp.sum(sq_t)

    total = lw * total
    if reduction == 'sum':
        return total
    # TODO(synk): newer mmdet divides by (avg_factor + eps); this matches the
    # original exact division.
    denom = (jnp.asarray(avg_factor, jnp.float32) if avg_factor is not None
             else jnp.float32(numel))
    return total / denom


class MSELoss:
    """JAX/Pallas port of mmdet MSELoss (no learnable parameters)."""

    def __init__(self, reduction='mean', loss_weight=1.0):
        self.reduction = reduction
        self.loss_weight = loss_weight

    def __call__(self, pred, target, weight=None, avg_factor=None):
        return mse_loss_pallas(pred, target, weight,
                               reduction=self.reduction,
                               avg_factor=avg_factor,
                               loss_weight=self.loss_weight)


if __name__ == "__main__":
    key = jax.random.PRNGKey(0)
    k1, k2, k3 = jax.random.split(key, 3)

    # Primary example (NCHW feature map), large enough to take the Pallas path.
    shape = (2, 4, 64, 64)                       # 32768 elements
    pred = jax.random.normal(k1, shape, dtype=jnp.float32)
    target = jax.random.normal(k2, shape, dtype=jnp.float32)
    weight = jax.random.uniform(k3, shape, dtype=jnp.float32)

    loss_mod = MSELoss(reduction='mean', loss_weight=1.0)

    # mean, no weight (no-weight sum kernel)
    out_mean = jax.block_until_ready(loss_mod(pred, target))
    ref_mean = jnp.mean((pred - target) ** 2)
    assert jnp.allclose(out_mean, ref_mean, rtol=1e-5, atol=1e-5)

    # mean with weight + avg_factor
    out_wa = jax.block_until_ready(
        loss_mod(pred, target, weight=weight, avg_factor=100.0))
    ref_wa = jnp.sum((pred - target) ** 2 * weight) / 100.0
    assert jnp.allclose(out_wa, ref_wa, rtol=1e-4, atol=1e-4)

    # sum with weight
    out_sum = jax.block_until_ready(
        MSELoss(reduction='sum', loss_weight=0.5)(pred, target, weight=weight))
    ref_sum = 0.5 * jnp.sum((pred - target) ** 2 * weight)
    assert jnp.allclose(out_sum, ref_sum, rtol=1e-4, atol=1e-3)

    # none with weight (loss_weight folded in-kernel)
    out_none = jax.block_until_ready(
        MSELoss(reduction='none', loss_weight=2.0)(pred, target, weight=weight))
    ref_none = 2.0 * (pred - target) ** 2 * weight
    assert out_none.shape == pred.shape
    assert jnp.allclose(out_none, ref_none, rtol=1e-5, atol=1e-5)

    # none without weight
    out_none_nw = jax.block_until_ready(MSELoss('none')(pred, target))
    assert jnp.allclose(out_none_nw, (pred - target) ** 2, rtol=1e-5, atol=1e-5)

    # Tiny tensors take the fused-XLA fallback (launch cost would dominate).
    s1, s2, s3 = jax.random.split(jax.random.PRNGKey(1), 3)
    p_s = jax.random.normal(s1, (2, 4, 16, 16), dtype=jnp.float32)
    t_s = jax.random.normal(s2, (2, 4, 16, 16), dtype=jnp.float32)
    w_s = jax.random.uniform(s3, (2, 4, 16, 16), dtype=jnp.float32)
    assert jnp.allclose(MSELoss('mean')(p_s, t_s, weight=w_s),
                        jnp.mean((p_s - t_s) ** 2 * w_s), rtol=1e-5, atol=1e-6)
    assert jnp.allclose(MSELoss('none')(p_s, t_s),
                        (p_s - t_s) ** 2, rtol=1e-6, atol=1e-6)

    # Multi-step grid: 6*8*96*96 = 442368 elements -> 3456 rows -> 2 tiles.
    b1, b2, b3 = jax.random.split(jax.random.PRNGKey(2), 3)
    p_b = jax.random.normal(b1, (6, 8, 96, 96), dtype=jnp.float32)
    t_b = jax.random.normal(b2, (6, 8, 96, 96), dtype=jnp.float32)
    w_b = jax.random.uniform(b3, (6, 8, 96, 96), dtype=jnp.float32)
    assert jnp.allclose(MSELoss('mean')(p_b, t_b), jnp.mean((p_b - t_b) ** 2),
                        rtol=1e-4, atol=1e-5)
    assert jnp.allclose(MSELoss('sum')(p_b, t_b, weight=w_b),
                        jnp.sum((p_b - t_b) ** 2 * w_b), rtol=1e-4, atol=1e-2)
    assert jnp.allclose(MSELoss('none')(p_b, t_b, weight=w_b),
                        (p_b - t_b) ** 2 * w_b, rtol=1e-5, atol=1e-5)

    # 128-aligned but rows don't divide the tile: 'none' exercises boundary
    # blocks; sum exercises the aligned-prefix grid + jnp ragged tail.
    c1, c2 = jax.random.split(jax.random.PRNGKey(3), 2)
    p_c = jax.random.normal(c1, (5, 10, 64, 88), dtype=jnp.float32)   # 281600
    t_c = jax.random.normal(c2, (5, 10, 64, 88), dtype=jnp.float32)
    assert jnp.allclose(MSELoss('none')(p_c, t_c), (p_c - t_c) ** 2,
                        rtol=1e-5, atol=1e-5)
    assert jnp.allclose(MSELoss('sum')(p_c, t_c), jnp.sum((p_c - t_c) ** 2),
                        rtol=1e-4, atol=1e-2)

    # numel not a multiple of 128: 'none' uses the pad/crop slow path,
    # mean still runs the kernel on the aligned prefix + jnp tail.
    d1, d2, d3 = jax.random.split(jax.random.PRNGKey(4), 3)
    p_d = jax.random.normal(d1, (3, 7, 33, 35), dtype=jnp.float32)    # 24255
    t_d = jax.random.normal(d2, (3, 7, 33, 35), dtype=jnp.float32)
    w_d = jax.random.uniform(d3, (3, 7, 33, 35), dtype=jnp.float32)
    assert jnp.allclose(MSELoss('none')(p_d, t_d, weight=w_d),
                        (p_d - t_d) ** 2 * w_d, rtol=1e-5, atol=1e-5)
    assert jnp.allclose(MSELoss('mean')(p_d, t_d, weight=w_d),
                        jnp.mean((p_d - t_d) ** 2 * w_d), rtol=1e-4, atol=1e-5)

    print("KERNEL_OK")
</pallas_src>

<mosaic_0001>
module attributes {stable_mosaic.version = 11 : i64} {
  func.func @_sum_nw_kernel(%arg0: i32, %arg1: i32, %arg2: memref<256x128xf32, #tpu.memory_space<vmem>>, %arg3: memref<256x128xf32, #tpu.memory_space<vmem>>, %arg4: memref<8x128xf32, #tpu.memory_space<vmem>>) attributes {dimension_semantics = [#tpu.dimension_semantics<parallel>, #tpu.dimension_semantics<arbitrary>], iteration_bounds = array<i64: 1, 1>, scalar_prefetch = 0 : i64, scratch_operands = 0 : i64, tpu.core_type = #tpu.core_type<tc>, window_params = [{transform_indices = @transform_0, window_bounds = array<i64: 256, 128>}, {transform_indices = @transform_1, window_bounds = array<i64: 256, 128>}, {transform_indices = @transform_2, window_bounds = array<i64: 8, 128>}]} {
    %c0_i32 = arith.constant 0 : i32
    %0 = arith.cmpi eq, %arg1, %c0_i32 : i32
    %1 = arith.extui %0 : i1 to i32
    %c0_i32_0 = arith.constant 0 : i32
    %2 = arith.cmpi ne, %1, %c0_i32_0 : i32
    scf.if %2 {
      %cst_8 = arith.constant 0.000000e+00 : f32
      %12 = vector.broadcast %cst_8 : f32 to vector<8x128xf32>
      %c0_9 = arith.constant 0 : index
      %c0_10 = arith.constant 0 : index
      %13 = vector.load %arg4[%c0_9, %c0_10] : memref<8x128xf32, #tpu.memory_space<vmem>>, vector<8x128xf32>
      tpu.vector_store %arg4[%c0_9, %c0_10], %12 {strides = array<i32>} : memref<8x128xf32, #tpu.memory_space<vmem>>, vector<8x128xf32>,
    } else {
    }
    %c0 = arith.constant 0 : index
    %c0_1 = arith.constant 0 : index
    %3 = vector.load %arg2[%c0, %c0_1] : memref<256x128xf32, #tpu.memory_space<vmem>>, vector<256x128xf32>
    %c0_2 = arith.constant 0 : index
    %c0_3 = arith.constant 0 : index
    %4 = vector.load %arg3[%c0_2, %c0_3] : memref<256x128xf32, #tpu.memory_space<vmem>>, vector<256x128xf32>
    %5 = arith.subf %3, %4 : vector<256x128xf32>
    %6 = arith.mulf %5, %5 : vector<256x128xf32>
    %c0_4 = arith.constant 0 : index
    %c0_5 = arith.constant 0 : index
    %7 = vector.load %arg4[%c0_4, %c0_5] : memref<8x128xf32, #tpu.memory_space<vmem>>, vector<8x128xf32>
    %8 = vector.shape_cast %6 : vector<256x128xf32> to vector<32x8x128xf32>
    %cst = arith.constant dense<0.000000e+00> : vector<8x128xf32>
    %9 = vector.multi_reduction <add>, %8, %cst [0] : vector<32x8x128xf32> to vector<8x128xf32>
    %10 = arith.addf %7, %9 : vector<8x128xf32>
    %c0_6 = arith.constant 0 : index
    %c0_7 = arith.constant 0 : index
    %11 = vector.load %arg4[%c0_6, %c0_7] : memref<8x128xf32, #tpu.memory_space<vmem>>, vector<8x128xf32>
    tpu.vector_store %arg4[%c0_6, %c0_7], %10 {strides = array<i32>} : memref<8x128xf32, #tpu.memory_space<vmem>>, vector<8x128xf32>,
    return
  }
  func.func @transform_0(%arg0: i32, %arg1: i32) -> (i32, i32) {
    %c1_i32 = arith.constant 1 : i32
    %0 = arith.muli %arg0, %c1_i32 : i32
    %1 = arith.addi %0, %arg1 : i32
    %c0_i32 = arith.constant 0 : i32
    %c0_i32_0 = arith.constant 0 : i32
    return %1, %c0_i32 : i32, i32
  }
  func.func @transform_1(%arg0: i32, %arg1: i32) -> (i32, i32) {
    %c1_i32 = arith.constant 1 : i32
    %0 = arith.muli %arg0, %c1_i32 : i32
    %1 = arith.addi %0, %arg1 : i32
    %c0_i32 = arith.constant 0 : i32
    %c0_i32_0 = arith.constant 0 : i32
    return %1, %c0_i32 : i32, i32
  }
  func.func @transform_2(%arg0: i32, %arg1: i32) -> (i32, i32) {
    %c0_i32 = arith.constant 0 : i32
    %c0_i32_0 = arith.constant 0 : i32
    return %arg0, %c0_i32 : i32, i32
  }
}

</mosaic_0001>

<bundles_post_ra>
// kernel: tpu_custom_call.1
= control target key start
LH: loop header
LB: loop body
LE: loop exit
PB: predicated region body
PF: predicated region fallthrough
CT: control target
= control target key end

     0   :  { %7 = vsyncpa [#allocation3], 0  ;;  %s336_s0 = inlined_call_operand.hbm [shape: f32[256,128], index: 0, kind: input, shape index: {}]   ;;  %s337_s1 = inlined_call_operand.hbm [shape: f32[256,128], index: 1, kind: input, shape index: {}]   ;;  %s338_s2 = inlined_call_operand.hbm [shape: f32[8,128], index: 2, kind: output, shape index: {}]  }
   0x1   :  { %8 = vsyncpa [#allocation6], 0 }
   0x2   :  { %9 = vsyncpa [#allocation4], 0  ;;  %s307_s9 = smov [#allocation2]  }
   0x3   :  { %s19_s10 = sshll.u32 %s307_s9, 4  ;;  %s20_s10 = int_to_ptr.vmem [resolvable:$true] %s19_s10 }
   0x4   :  { %s249_s11 = scalar_lea.vmem %s20_s10, 4096  ;;  %p254_p1 = scmp.lt.s32.totalorder %s20_s10, %s20_s10 }
   0x5   :  { %p250_p0 = scmp.ne.s32.totalorder %s20_s10, %s249_s11  ;;  %p255_p2 = scmp.lt.s32.totalorder %s249_s11, %s249_s11 }
   0x7   :  { %p256_p3 = por %p255_p2, %p254_p1 }
   0x9   :  { %p257_p4 = pnand %p256_p3, %p250_p0 }
   0xb   :  { %260 = shalt.err (!%p257_p4)
}
   0xc   :  { %s308_s12 = smov 128   ;;  %s309_s13 = smov 8  }
   0xd   :  { %25 = dma.hbm_to_vmem [thread:$0]  %s336_s0, 4096, %s20_s10, [#allocation3], %s308_s12, %s308_s12, %s309_s13  }
   0xe   :  { %s310_s16 = smov [#allocation5]  }
   0xf   :  { %s35_s17 = sshll.u32 %s310_s16, 4  ;;  %s36_s17 = int_to_ptr.vmem [resolvable:$true] %s35_s17 }
  0x10   :  { %s269_s18 = scalar_lea.vmem %s36_s17, 4096  ;;  %p274_p6 = scmp.lt.s32.totalorder %s36_s17, %s36_s17 }
  0x11   :  { %p270_p5 = scmp.ne.s32.totalorder %s36_s17, %s269_s18  ;;  %p275_p7 = scmp.lt.s32.totalorder %s269_s18, %s269_s18 }
  0x13   :  { %p276_p8 = por %p275_p7, %p274_p6 }
  0x15   :  { %p277_p9 = pnand %p276_p8, %p270_p5 }
  0x17   :  { %280 = shalt.err (!%p277_p9)
}
  0x18   :  { %41 = dma.hbm_to_vmem [thread:$0]  %s337_s1, 4096, %s36_s17, [#allocation6], %s308_s12, %s308_s12, %s309_s13  }
  0x19   :  { %301 = dma.done.wait [#allocation3], 4096  }
  0x1a   :  { %302 = vsyncadd [#allocation3], 4294963200 }
  0x1b   :  { %303 = dma.done.wait [#allocation6], 4096  }
  0x1c   :  { %304 = vsyncadd [#allocation6], 4294963200  ;;  %v57_v0 = vld [vmem:[#allocation2] sm:$0xff]  ;;  %v58_v1 = vld [vmem:[#allocation2 + $0x8] sm:$0xff]  ;;  %s311_s0 = smov [#allocation7]  }
  0x1d   :  { %v89_v2 = vld [vmem:[#allocation5] sm:$0xff]  ;;  %v90_v3 = vld [vmem:[#allocation5 + $0x8] sm:$0xff]  ;;  %v59_v4 = vld [vmem:[#allocation2 + $0x10] sm:$0xff]  ;;  %s225_s1 = sshll.u32 %s311_s0, 4  ;;  %s226_s1 = int_to_ptr.vmem [resolvable:$true] %s225_s1 }
  0x1e   :  { %v91_v5 = vld [vmem:[#allocation5 + $0x10] sm:$0xff]  ;;  %v121_v6 = vsub.f32 %v57_v0, %v89_v2  ;;  %v122_v7 = vsub.f32 %v58_v1, %v90_v3  ;;  %v60_v8 = vld [vmem:[#allocation2 + $0x18] sm:$0xff]  ;;  %v61_v11 = vld [vmem:[#allocation2 + $0x20] sm:$0xff]  ;;  %s281_s21 = scalar_lea.vmem %s226_s1, 128  ;;  %p286_p11 = scmp.lt.s32.totalorder %s226_s1, %s226_s1 }
  0x1f   :  { %v92_v9 = vld [vmem:[#allocation5 + $0x18] sm:$0xff]  ;;  %v123_v10 = vsub.f32 %v59_v4, %v91_v5  ;;  %v93_v12 = vld [vmem:[#allocation5 + $0x20] sm:$0xff]  ;;  %v62_v16 = vld [vmem:[#allocation2 + $0x28] sm:$0xff]  ;;  %p282_p10 = scmp.ne.s32.totalorder %s226_s1, %s281_s21  ;;  %p287_p12 = scmp.lt.s32.totalorder %s281_s21, %s281_s21 }
  0x20   :  { %v124_v13 = vsub.f32 %v60_v8, %v92_v9  ;;  %v153_v14 = vmul.f32 %v121_v6, %v121_v6  ;;  %v154_v15 = vmul.f32 %v122_v7, %v122_v7  ;;  %v94_v17 = vld [vmem:[#allocation5 + $0x28] sm:$0xff]  ;;  %v125_v18 = vsub.f32 %v61_v11, %v93_v12  ;;  %v63_v20 = vld [vmem:[#allocation2 + $0x30] sm:$0xff]  ;;  %v64_v25 = vld [vmem:[#allocation2 + $0x38] sm:$0xff] }
  0x21   :  { %v155_v19 = vmul.f32 %v123_v10, %v123_v10  ;;  %v95_v21 = vld [vmem:[#allocation5 + $0x30] sm:$0xff]  ;;  %v126_v22 = vsub.f32 %v62_v16, %v94_v17  ;;  %v96_v26 = vld [vmem:[#allocation5 + $0x38] sm:$0xff]  ;;  %v65_v30 = vld [vmem:[#allocation2 + $0x40] sm:$0xff]  ;;  %p288_p13 = por %p287_p12, %p286_p11 }
  0x22   :  { %v156_v23 = vmul.f32 %v124_v13, %v124_v13  ;;  %v186_v24 = vadd.f32 %v154_v15, %v153_v14  ;;  %v127_v27 = vsub.f32 %v63_v20, %v95_v21  ;;  %v157_v28 = vmul.f32 %v125_v18, %v125_v18  ;;  %v97_v31 = vld [vmem:[#allocation5 + $0x40] sm:$0xff]  ;;  %v66_v35 = vld [vmem:[#allocation2 + $0x48] sm:$0xff]  ;;  %v67_v40 = vld [vmem:[#allocation2 + $0x50] sm:$0xff] }
  0x23   :  { %v128_v32 = vsub.f32 %v64_v25, %v96_v26  ;;  %v158_v33 = vmul.f32 %v126_v22, %v126_v22  ;;  %v98_v36 = vld [vmem:[#allocation5 + $0x48] sm:$0xff]  ;;  %v129_v37 = vsub.f32 %v65_v30, %v97_v31  ;;  %v99_v41 = vld [vmem:[#allocation5 + $0x50] sm:$0xff]  ;;  %v68_v45 = vld [vmem:[#allocation2 + $0x58] sm:$0xff]  ;;  %p289_p0 = pnand %p288_p13, %p282_p10 }
  0x24   :  { %v187_v29 = vadd.f32 %v186_v24, %v155_v19  ;;  %v159_v38 = vmul.f32 %v127_v27, %v127_v27  ;;  %v130_v42 = vsub.f32 %v66_v35, %v98_v36  ;;  %v100_v46 = vld [vmem:[#allocation5 + $0x58] sm:$0xff]  ;;  %v131_v47 = vsub.f32 %v67_v40, %v99_v41  ;;  %v69_v50 = vld [vmem:[#allocation2 + $0x60] sm:$0xff]  ;;  %v70_v55 = vld [vmem:[#allocation2 + $0x68] sm:$0xff] }
  0x25   :  { %v160_v43 = vmul.f32 %v128_v32, %v128_v32  ;;  %v161_v48 = vmul.f32 %v129_v37, %v129_v37  ;;  %v101_v51 = vld [vmem:[#allocation5 + $0x60] sm:$0xff]  ;;  %v132_v52 = vsub.f32 %v68_v45, %v100_v46  ;;  %v102_v56 = vld [vmem:[#allocation5 + $0x68] sm:$0xff]  ;;  %v71_v60 = vld [vmem:[#allocation2 + $0x70] sm:$0xff] }
  0x26   :  { %v188_v34 = vadd.f32 %v187_v29, %v156_v23  ;;  %v162_v53 = vmul.f32 %v130_v42, %v130_v42  ;;  %v133_v57 = vsub.f32 %v69_v50, %v101_v51  ;;  %v163_v58 = vmul.f32 %v131_v47, %v131_v47  ;;  %v103_v61 = vld [vmem:[#allocation5 + $0x70] sm:$0xff]  ;;  %v72_v1 = vld [vmem:[#allocation2 + $0x78] sm:$0xff]  ;;  %v73_v6 = vld [vmem:[#allocation2 + $0x80] sm:$0xff] }
  0x27   :  { %v134_v62 = vsub.f32 %v70_v55, %v102_v56  ;;  %v164_v63 = vmul.f32 %v132_v52, %v132_v52  ;;  %v104_v2 = vld [vmem:[#allocation5 + $0x78] sm:$0xff]  ;;  %v135_v3 = vsub.f32 %v71_v60, %v103_v61  ;;  %v105_v7 = vld [vmem:[#allocation5 + $0x80] sm:$0xff]  ;;  %v74_v11 = vld [vmem:[#allocation2 + $0x88] sm:$0xff] }
  0x28   :  { %v189_v39 = vadd.f32 %v188_v34, %v157_v28  ;;  %v165_v4 = vmul.f32 %v133_v57, %v133_v57  ;;  %v136_v8 = vsub.f32 %v72_v1, %v104_v2  ;;  %v106_v12 = vld [vmem:[#allocation5 + $0x88] sm:$0xff]  ;;  %v137_v13 = vsub.f32 %v73_v6, %v105_v7  ;;  %v75_v16 = vld [vmem:[#allocation2 + $0x90] sm:$0xff]  ;;  %v76_v21 = vld [vmem:[#allocation2 + $0x98] sm:$0xff] }
  0x29   :  { %v166_v9 = vmul.f32 %v134_v62, %v134_v62  ;;  %v167_v14 = vmul.f32 %v135_v3, %v135_v3  ;;  %v107_v17 = vld [vmem:[#allocation5 + $0x90] sm:$0xff]  ;;  %v138_v18 = vsub.f32 %v74_v11, %v106_v12  ;;  %v108_v22 = vld [vmem:[#allocation5 + $0x98] sm:$0xff]  ;;  %v77_v26 = vld [vmem:[#allocation2 + $0xa0] sm:$0xff] }
  0x2a   :  { %v190_v44 = vadd.f32 %v189_v39, %v158_v33  ;;  %v168_v19 = vmul.f32 %v136_v8, %v136_v8  ;;  %v139_v23 = vsub.f32 %v75_v16, %v107_v17  ;;  %v169_v24 = vmul.f32 %v137_v13, %v137_v13  ;;  %v109_v27 = vld [vmem:[#allocation5 + $0xa0] sm:$0xff]  ;;  %v78_v31 = vld [vmem:[#allocation2 + $0xa8] sm:$0xff]  ;;  %v79_v36 = vld [vmem:[#allocation2 + $0xb0] sm:$0xff] }
  0x2b   :  { %v140_v28 = vsub.f32 %v76_v21, %v108_v22  ;;  %v170_v29 = vmul.f32 %v138_v18, %v138_v18  ;;  %v110_v32 = vld [vmem:[#allocation5 + $0xa8] sm:$0xff]  ;;  %v141_v33 = vsub.f32 %v77_v26, %v109_v27  ;;  %v111_v37 = vld [vmem:[#allocation5 + $0xb0] sm:$0xff]  ;;  %v80_v41 = vld [vmem:[#allocation2 + $0xb8] sm:$0xff] }
  0x2c   :  { %v191_v49 = vadd.f32 %v190_v44, %v159_v38  ;;  %v171_v34 = vmul.f32 %v139_v23, %v139_v23  ;;  %v142_v38 = vsub.f32 %v78_v31, %v110_v32  ;;  %v112_v42 = vld [vmem:[#allocation5 + $0xb8] sm:$0xff]  ;;  %v81_v46 = vld [vmem:[#allocation2 + $0xc0] sm:$0xff]  ;;  %v82_v51 = vld [vmem:[#allocation2 + $0xc8] sm:$0xff] }
  0x2d   :  { %v172_v39 = vmul.f32 %v140_v28, %v140_v28  ;;  %v173_v44 = vmul.f32 %v141_v33, %v141_v33  ;;  %v113_v47 = vld [vmem:[#allocation5 + $0xc0] sm:$0xff]  ;;  %v114_v52 = vld [vmem:[#allocation5 + $0xc8] sm:$0xff]  ;;  %v83_v56 = vld [vmem:[#allocation2 + $0xd0] sm:$0xff] }
  0x2e   :  { %v192_v54 = vadd.f32 %v191_v49, %v160_v43  ;;  %v143_v43 = vsub.f32 %v79_v36, %v111_v37  ;;  %v174_v49 = vmul.f32 %v142_v38, %v142_v38  ;;  %v115_v57 = vld [vmem:[#allocation5 + $0xd0] sm:$0xff]  ;;  %v84_v61 = vld [vmem:[#allocation2 + $0xd8] sm:$0xff]  ;;  %v85_v2 = vld [vmem:[#allocation2 + $0xe0] sm:$0xff] }
  0x2f   :  { %v116_v62 = vld [vmem:[#allocation5 + $0xd8] sm:$0xff]  ;;  %v117_v3 = vld [vmem:[#allocation5 + $0xe0] sm:$0xff]  ;;  %v86_v7 = vld [vmem:[#allocation2 + $0xe8] sm:$0xff] }
  0x30   :  { %v193_v59 = vadd.f32 %v192_v54, %v161_v48  ;;  %v144_v48 = vsub.f32 %v80_v41, %v112_v42  ;;  %v175_v54 = vmul.f32 %v143_v43, %v143_v43  ;;  %v118_v8 = vld [vmem:[#allocation5 + $0xe8] sm:$0xff]  ;;  %v87_v12 = vld [vmem:[#allocation2 + $0xf0] sm:$0xff]  ;;  %v88_v17 = vld [vmem:[#allocation2 + $0xf8] sm:$0xff] }
  0x31   :  { %v119_v13 = vld [vmem:[#allocation5 + $0xf0] sm:$0xff]  ;;  %v120_v18 = vld [vmem:[#allocation5 + $0xf8] sm:$0xff] }
  0x32   :  { %v194_v0 = vadd.f32 %v193_v59, %v162_v53  ;;  %v145_v53 = vsub.f32 %v81_v46, %v113_v47  ;;  %v176_v59 = vmul.f32 %v144_v48, %v144_v48  ;;  %v152_v22 = vsub.f32 %v88_v17, %v120_v18 }
  0x34   :  { %v195_v5 = vadd.f32 %v194_v0, %v163_v58  ;;  %v146_v58 = vsub.f32 %v82_v51, %v114_v52  ;;  %v177_v0 = vmul.f32 %v145_v53, %v145_v53  ;;  %v184_v27 = vmul.f32 %v152_v22, %v152_v22 }
  0x36   :  { %v196_v10 = vadd.f32 %v195_v5, %v164_v63  ;;  %v147_v63 = vsub.f32 %v83_v56, %v115_v57  ;;  %v178_v5 = vmul.f32 %v146_v58, %v146_v58 }
  0x38   :  { %v197_v15 = vadd.f32 %v196_v10, %v165_v4  ;;  %v148_v4 = vsub.f32 %v84_v61, %v116_v62  ;;  %v179_v10 = vmul.f32 %v147_v63, %v147_v63 }
  0x3a   :  { %v198_v20 = vadd.f32 %v197_v15, %v166_v9  ;;  %v149_v9 = vsub.f32 %v85_v2, %v117_v3  ;;  %v180_v15 = vmul.f32 %v148_v4, %v148_v4 }
  0x3c   :  { %v199_v25 = vadd.f32 %v198_v20, %v167_v14  ;;  %v150_v14 = vsub.f32 %v86_v7, %v118_v8  ;;  %v181_v20 = vmul.f32 %v149_v9, %v149_v9 }
  0x3e   :  { %v200_v30 = vadd.f32 %v199_v25, %v168_v19  ;;  %v151_v19 = vsub.f32 %v87_v12, %v119_v13  ;;  %v182_v23 = vmul.f32 %v150_v14, %v150_v14 }
  0x40   :  { %v201_v35 = vadd.f32 %v200_v30, %v169_v24  ;;  %v183_v25 = vmul.f32 %v151_v19, %v151_v19 }
  0x42   :  { %v202_v40 = vadd.f32 %v201_v35, %v170_v29 }
  0x44   :  { %v203_v45 = vadd.f32 %v202_v40, %v171_v34 }
  0x46   :  { %v204_v50 = vadd.f32 %v203_v45, %v172_v39 }
  0x48   :  { %v205_v55 = vadd.f32 %v204_v50, %v173_v44 }
  0x4a   :  { %v206_v60 = vadd.f32 %v205_v55, %v174_v49 }
  0x4c   :  { %v207_v1 = vadd.f32 %v206_v60, %v175_v54 }
  0x4e   :  { %v208_v6 = vadd.f32 %v207_v1, %v176_v59 }
  0x50   :  { %v209_v11 = vadd.f32 %v208_v6, %v177_v0 }
  0x52   :  { %v210_v16 = vadd.f32 %v209_v11, %v178_v5 }
  0x54   :  { %v211_v21 = vadd.f32 %v210_v16, %v179_v10 }
  0x56   :  { %v212_v24 = vadd.f32 %v211_v21, %v180_v15 }
  0x58   :  { %v213_v26 = vadd.f32 %v212_v24, %v181_v20 }
  0x5a   :  { %v214_v28 = vadd.f32 %v213_v26, %v182_v23 }
  0x5c   :  { %v215_v29 = vadd.f32 %v214_v28, %v183_v25 }
  0x5e   :  { %v216_v30 = vadd.f32 %v215_v29, %v184_v27 }
  0x60   :  { %218 = vst [vmem:[#allocation7] sm:$0xff] %v216_v30 }
  0x61   :  { %292 = shalt.err (!%p289_p0)
}
  0x62   :  { %228 = dma.vmem_to_hbm [thread:$0]  %s226_s1, 128, %s338_s2, [#allocation4]  }
  0x63   :  { %305 = dma.done.wait [#allocation4], 128  }
  0x64   :  { %306 = vsyncadd [#allocation4], 4294967168 }
  0x65   :  { %232 = vsyncpa [#allocation3], 1 }
  0x66   :  { %233 = vsyncpa [#allocation6], 1 }
  0x67   :  { %234 = vsyncpa [#allocation4], 1 }

</bundles_post_ra>
